<compile_context>
chip_gen: v7x
topology: tpu7x:2x2x1
jax: 0.10.0
libtpu: 0.0.40
codegen_flags: <defaults>
</compile_context>

<pallas_src>
import functools

import jax
import jax.numpy as jnp
from jax.experimental import pallas as pl
from jax.experimental.pallas import tpu as pltpu


def _hinge_tile_kernel(out_ref, y_ref, partial_ref, *, margin, p, n_total, tm):
    i = pl.program_id(0)
    out = out_ref[...].astype(jnp.float32)        # (TM, C) native dtype -> f32 in-reg
    y = y_ref[...]                                # (TM, 1)  i32
    tm_, c = out.shape

    # one-hot of the true class; gather output[n, y_n] via masked row-reduce
    class_ids = jax.lax.broadcasted_iota(jnp.int32, (tm_, c), 1)
    onehot = class_ids == y
    out_y = jnp.sum(jnp.where(onehot, out, 0.0), axis=1, keepdims=True)

    hinge = jnp.maximum(out - out_y + jnp.float32(margin), 0.0)
    if p == 2:
        hinge = hinge * hinge                     # VPU mul, avoid EUP log/exp
    elif p != 1:
        hinge = jnp.power(hinge, jnp.float32(p))
    # TODO(synk): per-class `weight` is None in the module defaults; multiply a
    # broadcast (1, C) weight row into `hinge` here if ever needed.

    # per-row sums over classes, then subtract the true-class contribution:
    # hinge at the true class is exactly max(0, margin) (independent of data),
    # so a scalar correction per valid row replaces a full (TM, C) mask.
    row_sums = jnp.sum(hinge, axis=1, keepdims=True)        # (TM, 1)
    true_term = jnp.float32(max(float(margin), 0.0) ** p)
    row_sums = row_sums - true_term

    # drop the padded rows of the ragged last tile (TM compares, not TM*C;
    # jnp.where also discards any garbage/NaN in the out-of-bounds rows)
    row_ids = i * tm + jax.lax.broadcasted_iota(jnp.int32, (tm_, 1), 0)
    row_sums = jnp.where(row_ids < n_total, row_sums, 0.0)

    tile_sum = jnp.sum(row_sums)                  # f32 partial for this tile
    partial_ref[...] = jnp.full(partial_ref.shape, tile_sum, jnp.float32)


def _round_up(v, m):
    return ((v + m - 1) // m) * m


def multi_class_hinge_loss(output, y, *, p=1, margin=1.0, size_average=True,
                           tile_rows=None):
    """output: (N, C) float (f32/bf16), y: (N,) integer labels. Returns scalar f32."""
    n, c = output.shape
    y2d = y.astype(jnp.int32).reshape(n, 1)
    itemsize = jnp.dtype(output.dtype).itemsize
    c_lanes = _round_up(c, 128)                   # VMEM lane footprint for budgeting

    if tile_rows is None:
        # ~6 MiB per input tile (12 MiB double-buffered): safe under v5e's
        # 16 MiB scoped-VMEM default, big enough to amortize per-step overhead
        # on v6e/v7x.  Rows capped at 4096, multiple of 16 (bf16 packing).
        budget = 6 * 1024 * 1024
        tm = budget // (c_lanes * itemsize)
        tm = max(16, min(4096, (tm // 16) * 16))
        # keep >= 2 grid tiles whenever N allows: the grid axis is "parallel",
        # so v7x's two TensorCores can each take a half.
        half = max(16, _round_up((n + 1) // 2, 16))
        tm = min(tm, half)
    else:
        tm = max(16, (int(tile_rows) // 16) * 16)

    num_tiles = pl.cdiv(n, tm)

    kernel = functools.partial(
        _hinge_tile_kernel, margin=margin, p=p, n_total=n, tm=tm)

    partials = pl.pallas_call(
        kernel,
        out_shape=jax.ShapeDtypeStruct((num_tiles, 8, 128), jnp.float32),
        grid=(num_tiles,),
        in_specs=[
            # last block dim == full class dim -> legal for any C, no padding,
            # ragged last row-tile handled by the in-kernel row mask.
            pl.BlockSpec((tm, c), lambda i: (i, 0)),
            pl.BlockSpec((tm, 1), lambda i: (i, 0)),
        ],
        out_specs=pl.BlockSpec((1, 8, 128), lambda i: (i, 0, 0)),
        compiler_params=pltpu.CompilerParams(
            dimension_semantics=("parallel",)),
        cost_estimate=pl.CostEstimate(
            flops=6 * n * c,
            transcendentals=0,
            bytes_accessed=n * c * itemsize + n * 4
                           + num_tiles * 8 * 128 * 4),
    )(output, y2d)

    total = jnp.sum(partials[:, 0, 0])            # f32 reduction of per-tile sums
    if size_average:
        total = total / jnp.float32(n)            # divide by the TOTAL batch size
    return total


def _reference(output, y, *, p=1, margin=1.0, size_average=True):
    output = output.astype(jnp.float32)
    n = output.shape[0]
    out_y = output[jnp.arange(n), y][:, None]
    loss = output - out_y + margin
    loss = loss.at[jnp.arange(n), y].set(0.0)
    loss = jnp.maximum(loss, 0.0)
    if p != 1:
        loss = jnp.power(loss, p)
    total = jnp.sum(loss)
    if size_average:
        total = total / n
    return total


if __name__ == "__main__":
    key = jax.random.PRNGKey(0)
    k1, k2, k3, k4, k5, k6 = jax.random.split(key, 6)

    # Case 1: the module's small synthetic shape (batch=8, classes=32), f32
    N, C = 8, 32
    output = jax.random.normal(k1, (N, C), dtype=jnp.float32)
    y = jax.random.randint(k2, (N,), 0, C, dtype=jnp.int32)
    loss = multi_class_hinge_loss(output, y, p=1, margin=1.0, size_average=True)
    loss = jax.block_until_ready(loss)
    ref = _reference(output, y, p=1, margin=1.0, size_average=True)
    assert jnp.allclose(loss, ref, rtol=1e-5, atol=1e-5), (loss, ref)

    # Case 2: multi-tile + ragged last tile path (no padding anywhere)
    N2, C2 = 40, 32
    output2 = jax.random.normal(k3, (N2, C2), dtype=jnp.float32)
    y2 = jax.random.randint(k4, (N2,), 0, C2, dtype=jnp.int32)
    loss2 = multi_class_hinge_loss(output2, y2, p=1, margin=1.0,
                                   size_average=True, tile_rows=16)
    loss2 = jax.block_until_ready(loss2)
    ref2 = _reference(output2, y2, p=1, margin=1.0, size_average=True)
    assert jnp.allclose(loss2, ref2, rtol=1e-5, atol=1e-5), (loss2, ref2)

    # Case 3: native bf16 DMA + in-kernel cast, p=2, C not a multiple of 128
    N3, C3 = 50, 100
    output3 = jax.random.normal(k5, (N3, C3), dtype=jnp.float32).astype(jnp.bfloat16)
    y3 = jax.random.randint(k6, (N3,), 0, C3, dtype=jnp.int32)
    loss3 = multi_class_hinge_loss(output3, y3, p=2, margin=0.5, size_average=True)
    loss3 = jax.block_until_ready(loss3)
    ref3 = _reference(output3, y3, p=2, margin=0.5, size_average=True)
    assert jnp.allclose(loss3, ref3, rtol=1e-3, atol=1e-3), (loss3, ref3)

    print("KERNEL_OK")
</pallas_src>

<mosaic_0001>
module attributes {stable_mosaic.version = 11 : i64} {
  func.func @_hinge_tile_kernel(%arg0: i32, %arg1: memref<16x32xf32, #tpu.memory_space<vmem>>, %arg2: memref<16x1xi32, #tpu.memory_space<vmem>>, %arg3: memref<1x8x128xf32, #tpu.memory_space<vmem>>) attributes {dimension_semantics = [#tpu.dimension_semantics<parallel>], iteration_bounds = array<i64: 1>, scalar_prefetch = 0 : i64, scratch_operands = 0 : i64, tpu.core_type = #tpu.core_type<tc>, window_params = [{transform_indices = @transform_0, window_bounds = array<i64: 16, 32>}, {transform_indices = @transform_1, window_bounds = array<i64: 16, 1>}, {transform_indices = @transform_2, window_bounds = array<i64: 1, 8, 128>}]} {
    %c0 = arith.constant 0 : index
    %c0_0 = arith.constant 0 : index
    %0 = vector.load %arg1[%c0, %c0_0] : memref<16x32xf32, #tpu.memory_space<vmem>>, vector<16x32xf32>
    %c0_1 = arith.constant 0 : index
    %c0_2 = arith.constant 0 : index
    %1 = vector.load %arg2[%c0_1, %c0_2] : memref<16x1xi32, #tpu.memory_space<vmem>>, vector<16x1xi32>
    %2 = tpu.iota {dimensions = array<i32: 1>} : vector<16x32xi32>
    %3 = vector.broadcast %1 : vector<16x1xi32> to vector<16x32xi32>
    %4 = arith.cmpi eq, %2, %3 : vector<16x32xi32>
    %cst = arith.constant 0.000000e+00 : f32
    %5 = vector.broadcast %cst : f32 to vector<16x32xf32>
    %6 = arith.select %4, %0, %5 : vector<16x32xi1>, vector<16x32xf32>
    %cst_3 = arith.constant dense<0.000000e+00> : vector<16xf32>
    %7 = vector.multi_reduction <add>, %6, %cst_3 [1] : vector<16x32xf32> to vector<16xf32>
    %8 = vector.shape_cast %7 : vector<16xf32> to vector<16x1xf32>
    %9 = vector.broadcast %8 : vector<16x1xf32> to vector<16x32xf32>
    %10 = arith.subf %0, %9 : vector<16x32xf32>
    %cst_4 = arith.constant 1.000000e+00 : f32
    %11 = vector.broadcast %cst_4 : f32 to vector<16x32xf32>
    %12 = arith.addf %10, %11 : vector<16x32xf32>
    %cst_5 = arith.constant 0.000000e+00 : f32
    %13 = vector.broadcast %cst_5 : f32 to vector<16x32xf32>
    %14 = arith.maximumf %12, %13 : vector<16x32xf32>
    %cst_6 = arith.constant dense<0.000000e+00> : vector<16xf32>
    %15 = vector.multi_reduction <add>, %14, %cst_6 [1] : vector<16x32xf32> to vector<16xf32>
    %16 = vector.shape_cast %15 : vector<16xf32> to vector<16x1xf32>
    %cst_7 = arith.constant 1.000000e+00 : f32
    %17 = vector.broadcast %cst_7 : f32 to vector<16x1xf32>
    %18 = arith.subf %16, %17 : vector<16x1xf32>
    %c16_i32 = arith.constant 16 : i32
    %19 = arith.muli %arg0, %c16_i32 : i32
    %20 = tpu.iota {dimensions = array<i32: 0>} : vector<16x1xi32>
    %21 = vector.broadcast %19 : i32 to vector<16x1xi32>
    %22 = arith.addi %21, %20 : vector<16x1xi32>
    %c8_i32 = arith.constant 8 : i32
    %23 = vector.broadcast %c8_i32 : i32 to vector<16x1xi32>
    %24 = arith.cmpi slt, %22, %23 : vector<16x1xi32>
    %cst_8 = arith.constant 0.000000e+00 : f32
    %25 = vector.broadcast %cst_8 : f32 to vector<16x1xf32>
    %26 = arith.select %24, %18, %25 : vector<16x1xi1>, vector<16x1xf32>
    %27 = vector.shape_cast %26 : vector<16x1xf32> to vector<1x16x1xf32>
    %cst_9 = arith.constant dense<0.000000e+00> : vector<1xf32>
    %28 = vector.multi_reduction <add>, %27, %cst_9 [1, 2] : vector<1x16x1xf32> to vector<1xf32>
    %29 = vector.shape_cast %28 : vector<1xf32> to vector<1x1x1xf32>
    %30 = vector.extract %29[0, 0, 0] : f32 from vector<1x1x1xf32>
    %31 = vector.broadcast %30 : f32 to vector<1x8x128xf32>
    %c0_10 = arith.constant 0 : index
    %c0_11 = arith.constant 0 : index
    %c0_12 = arith.constant 0 : index
    %32 = vector.load %arg3[%c0_10, %c0_11, %c0_12] : memref<1x8x128xf32, #tpu.memory_space<vmem>>, vector<1x8x128xf32>
    tpu.vector_store %arg3[%c0_10, %c0_11, %c0_12], %31 {strides = array<i32>} : memref<1x8x128xf32, #tpu.memory_space<vmem>>, vector<1x8x128xf32>,
    return
  }
  func.func @transform_0(%arg0: i32) -> (i32, i32) {
    %c0_i32 = arith.constant 0 : i32
    %c0_i32_0 = arith.constant 0 : i32
    return %arg0, %c0_i32 : i32, i32
  }
  func.func @transform_1(%arg0: i32) -> (i32, i32) {
    %c0_i32 = arith.constant 0 : i32
    %c0_i32_0 = arith.constant 0 : i32
    return %arg0, %c0_i32 : i32, i32
  }
  func.func @transform_2(%arg0: i32) -> (i32, i32, i32) {
    %c0_i32 = arith.constant 0 : i32
    %c0_i32_0 = arith.constant 0 : i32
    %c0_i32_1 = arith.constant 0 : i32
    return %arg0, %c0_i32, %c0_i32_0 : i32, i32, i32
  }
}

</mosaic_0001>

<bundles_post_ra>
// kernel: tpu_custom_call.1
= control target key start
LH: loop header
LB: loop body
LE: loop exit
PB: predicated region body
PF: predicated region fallthrough
CT: control target
= control target key end

     0   :  { %s155_s0 = inlined_call_operand.vmem [shape: f32[8,32], index: 0, kind: input, shape index: {}]   ;;  %s156_s1 = inlined_call_operand.vmem [shape: s32[8,1], index: 1, kind: input, shape index: {}]   ;;  %s157_s2 = inlined_call_operand.hbm [shape: f32[1,8,128], index: 2, kind: output, shape index: {}]  }
   0x1   :  { %v14_v0 = vld [vmem:[%s156_s1] sm:$0xff] }
   0x2   :  { %7 = vsyncpa [#allocation3], 0  ;;  %v120_v1 = vmov 0   ;;  %v16_v2 = vlaneseq  ;;  %v12_v4 = vld [vmem:[%s155_s0] sm:$0xff]  ;;  %vm28_vm0 = vcmask 261120   ;;  %vm60_vm2 = vcmask 7168  }
   0x3   :  { %95 = vset.pattern.permute.xlu0 %v120_v1  ;;  %s121_s0 = smov [#allocation2]  }
   0x4   :  { %19 = vperm.xlu0 %95, %v14_v0   ;;  %v17_v3 = vand.u32 127, %v16_v2  ;;  %s81_s1 = sshll.u32 %s121_s0, 4  ;;  %s82_s1 = int_to_ptr.vmem [resolvable:$true] %s81_s1 }
   0x5   :  { %s96_s14 = scalar_lea.vmem %s82_s1, 128  ;;  %p101_p1 = scmp.lt.s32.totalorder %s82_s1, %s82_s1 }
   0x6   :  { %p97_p0 = scmp.ne.s32.totalorder %s82_s1, %s96_s14  ;;  %p102_p2 = scmp.lt.s32.totalorder %s96_s14, %s96_s14 }
   0x8   :  { %p103_p3 = por %p102_p2, %p101_p1 }
   0xa   :  { %p104_p4 = pnand %p103_p3, %p97_p0 }
  0x83   :  { %v20_v5 = vpop.permute.xlu0 %19 }
  0x84   :  { %vm24_vm1 = vcmp.eq.s32.totalorder %v17_v3, %v20_v5 }
  0x85   :  { %v26_v6 = vsel %vm24_vm1, %v12_v4, 0.0 }
  0x86   :  { %v29_v7 = vsel %vm28_vm0, %v26_v6, 0.0 }
  0x87   :  { %30 = vadd.xlane.f32.xlu0 %v29_v7 }
 0x114   :  { %v31_v8 = vpop.xlane.xlu0 %30 }
 0x115   :  { %v35_v9 = vsub.f32 %v12_v4, %v31_v8 }
 0x117   :  { %v37_v10 = vadd.f32 1.0, %v35_v9 }
 0x119   :  { %v39_v11 = vmax.f32 %v37_v10, 0.0 }
 0x11b   :  { %v41_v12 = vsel %vm28_vm0, %v39_v11, 0.0 }
 0x11c   :  { %42 = vadd.xlane.f32.xlu1 %v41_v12 }
 0x1a9   :  { %v43_v13 = vpop.xlane.xlu1 %42 }
 0x1aa   :  { %v89_v14 = vadd.f32 -1.0, %v43_v13 }
 0x1ac   :  { %v61_v15 = vsel %vm60_vm2, %v89_v14, 0.0 }
 0x1ad   :  { %64 = vadd.xlane.f32.xlu1 %v61_v15 }
 0x23a   :  { %v65_v16 = vpop.xlane.xlu1 %64 }
 0x23b   :  { %v66_v17 = vrot.slane %v65_v16, 4 }
 0x23d   :  { %v67_v18 = vadd.f32 %v66_v17, %v65_v16 }
 0x23f   :  { %v68_v19 = vrot.slane %v67_v18, 2 }
 0x241   :  { %v69_v20 = vadd.f32 %v68_v19, %v67_v18 }
 0x243   :  { %v70_v21 = vrot.slane %v69_v20, 1 }
 0x245   :  { %v71_v22 = vadd.f32 %v70_v21, %v69_v20 }
 0x247   :  { %91 = vpush %v71_v22 }
 0x278   :  { %s92_s13 = spop %91 }
 0x279   :  { %v73_v23 = vstv %s92_s13 }
 0x27a   :  { %74 = vst [vmem:[#allocation2] sm:$0xff] %v73_v23 }
 0x27b   :  { %107 = shalt.err (!%p104_p4)
}
 0x27c   :  { %s108_s17 = scalar_lea.hbm %s157_s2, 128 }
 0x27d   :  { %p109_p5 = scmp.ne.s32.totalorder %s157_s2, %s108_s17  ;;  %p112_p6 = scmp.lt.u32.totalorder %s108_s17, %s157_s2 }
 0x27f   :  { %p114_p7 = pnand %p112_p6, %p109_p5 }
 0x281   :  { %117 = shalt.err (!%p114_p7)
}
 0x282   :  { %84 = dma.vmem_to_hbm [thread:$0]  %s82_s1, 128, %s157_s2, [#allocation3]  }
 0x283   :  { %118 = dma.done.wait [#allocation3], 128  }
 0x284   :  { %119 = vsyncadd [#allocation3], 4294967168 }
 0x285   :  { %88 = vsyncpa [#allocation3], 1 }

</bundles_post_ra>
